<compile_context>
chip_gen: v7x
topology: tpu7x:2x2x1
jax: 0.10.0
libtpu: 0.0.40
codegen_flags: <defaults>
</compile_context>

<pallas_src>
import functools

import jax
import jax.numpy as jnp
from jax.experimental import pallas as pl
from jax.experimental.pallas import tpu as pltpu


def _per_row_losses(pred_ref, label_ref, *, eps, avg, inv_temp):
    """Per-sample smoothed-CE losses for one (TN, C) tile -> (TN, 1) f32."""
    pred = pred_ref[...].astype(jnp.float32)
    if inv_temp != 1.0:                       # compile-time constant branch
        pred = pred * jnp.float32(inv_temp)
    c = pred.shape[1]

    m = jnp.max(pred, axis=1, keepdims=True)                          # (TN, 1)
    lse = jnp.log(jnp.sum(jnp.exp(pred - m), axis=1, keepdims=True))  # (TN, 1)
    m_lse = m + lse

    row_sum = jnp.sum(pred, axis=1, keepdims=True)                    # (TN, 1)
    cls_iota = jax.lax.broadcasted_iota(jnp.int32, pred.shape, 1)
    lbl = label_ref[...]                                              # (TN, 1) i32
    pred_at_lbl = jnp.sum(jnp.where(cls_iota == lbl, pred, 0.0),
                          axis=1, keepdims=True)                      # (TN, 1)

    # -sum_j one_hot[j] * (pred[j] - m - lse),
    #   one_hot[j] = avg everywhere, with an extra (1 - eps) at j == label.
    return -(avg * (row_sum - float(c) * m_lse)
             + (1.0 - eps) * (pred_at_lbl - m_lse))


def _sum_kernel(pred_ref, label_ref, out_ref, *, eps, avg, inv_temp, n_valid):
    """Accumulates the total (masked) loss sum into a resident (1,1) output."""
    tn = pred_ref.shape[0]
    loss = _per_row_losses(pred_ref, label_ref, eps=eps, avg=avg,
                           inv_temp=inv_temp)
    # Mask rows that are only padding so they don't pollute the reduction.
    row = (pl.program_id(0) * tn
           + jax.lax.broadcasted_iota(jnp.int32, (tn, 1), 0))
    loss = jnp.where(row < n_valid, loss, 0.0)

    @pl.when(pl.program_id(0) == 0)
    def _():
        out_ref[...] = jnp.zeros_like(out_ref)

    out_ref[...] += jnp.sum(loss, axis=0, keepdims=True)


def _per_sample_kernel(pred_ref, label_ref, out_ref, *, eps, avg, inv_temp):
    out_ref[...] = _per_row_losses(pred_ref, label_ref, eps=eps, avg=avg,
                                   inv_temp=inv_temp)


def _pick_tile(n, c, itemsize, target_bytes=2 << 20):
    """Batch-tile size: multiple of 8, ~2 MiB of input per block, <= padded N."""
    n_pad8 = ((n + 7) // 8) * 8
    tn = max(8, min(((target_bytes // (c * itemsize)) // 8) * 8, 1024))
    return int(min(tn, n_pad8))


def label_smooth_loss(cls_score, label, *, label_smooth_eps, num_classes,
                      temperature=1.0, reduction='mean', loss_weight=1.0,
                      avg_factor=None):
    """JAX/Pallas equivalent of LabelSmoothLoss.forward (weight=None)."""
    assert cls_score.ndim == 2
    assert reduction in ('none', 'mean', 'sum')
    n, c = cls_score.shape
    assert c == num_classes

    eps = float(label_smooth_eps)
    avg = eps / num_classes
    inv_temp = 1.0 / float(temperature)

    itemsize = jnp.dtype(cls_score.dtype).itemsize
    tn = _pick_tile(n, c, itemsize)
    n_pad = int(pl.cdiv(n, tn)) * tn
    num_tiles = n_pad // tn

    label2d = label.reshape(-1, 1).astype(jnp.int32)
    if n_pad != n:
        cls_score = jnp.pad(cls_score, ((0, n_pad - n), (0, 0)))
        label2d = jnp.pad(label2d, ((0, n_pad - n), (0, 0)))

    in_specs = [
        pl.BlockSpec((tn, c), lambda i: (i, 0)),   # native dtype, no upcast
        pl.BlockSpec((tn, 1), lambda i: (i, 0)),
    ]
    # Double-buffered input + generous headroom for the in-kernel f32 temps.
    vmem_limit = int(min(48 << 20,
                         max(2 * tn * c * itemsize + 6 * tn * c * 4 + (4 << 20),
                             16 << 20)))
    cost = pl.CostEstimate(
        flops=int(6 * n_pad * c),
        transcendentals=int(n_pad * c + n_pad),
        bytes_accessed=int(n_pad * c * itemsize + n_pad * 4 + n_pad * 4),
    )

    if reduction in ('mean', 'sum'):
        kernel = functools.partial(_sum_kernel, eps=eps, avg=avg,
                                   inv_temp=inv_temp, n_valid=n)
        total = pl.pallas_call(
            kernel,
            grid=(num_tiles,),
            in_specs=in_specs,
            out_specs=pl.BlockSpec((1, 1), lambda i: (0, 0)),
            out_shape=jax.ShapeDtypeStruct((1, 1), jnp.float32),
            compiler_params=pltpu.CompilerParams(
                dimension_semantics=("arbitrary",),   # resident accumulator
                vmem_limit_bytes=vmem_limit),
            cost_estimate=cost,
        )(cls_score, label2d)[0, 0]

        if reduction == 'mean':
            denom = jnp.float32(n) if avg_factor is None else avg_factor
            loss = total / denom
        else:
            assert avg_factor is None  # weight_reduce_loss: avg_factor needs 'mean'
            loss = total
    else:  # 'none' -> per-sample losses, row-parallel grid
        assert avg_factor is None
        kernel = functools.partial(_per_sample_kernel, eps=eps, avg=avg,
                                   inv_temp=inv_temp)
        per_sample = pl.pallas_call(
            kernel,
            grid=(num_tiles,),
            in_specs=in_specs,
            out_specs=pl.BlockSpec((tn, 1), lambda i: (i, 0)),
            out_shape=jax.ShapeDtypeStruct((n_pad, 1), jnp.float32),
            compiler_params=pltpu.CompilerParams(
                dimension_semantics=("parallel",),
                vmem_limit_bytes=vmem_limit),
            cost_estimate=cost,
        )(cls_score, label2d)
        loss = per_sample[:n, 0]

    return loss_weight * loss


def _reference(cls_score, label, *, label_smooth_eps, num_classes,
               temperature=1.0, reduction='mean', loss_weight=1.0,
               avg_factor=None):
    avg = label_smooth_eps / num_classes
    pred = cls_score.astype(jnp.float32) / temperature
    one_hot = jnp.full(pred.shape, avg, dtype=jnp.float32)
    one_hot = one_hot.at[jnp.arange(pred.shape[0]), label].set(
        1.0 - label_smooth_eps + avg)
    log_sm = jax.nn.log_softmax(pred, axis=1)
    loss = -jnp.sum(log_sm * one_hot, axis=1)
    if reduction == 'mean':
        loss = jnp.sum(loss) / (loss.shape[0] if avg_factor is None else avg_factor)
    elif reduction == 'sum':
        loss = jnp.sum(loss)
    return loss_weight * loss


if __name__ == "__main__":
    key = jax.random.PRNGKey(0)
    k1, k2, k3, k4 = jax.random.split(key, 4)

    # Case 1: small f32, default 'mean' reduction (module defaults).
    N, C = 8, 16
    cls_score = jax.random.normal(k1, (N, C), dtype=jnp.float32)
    label = jax.random.randint(k2, (N,), 0, C, dtype=jnp.int32)
    out = label_smooth_loss(cls_score, label, label_smooth_eps=0.1,
                            num_classes=C, temperature=1.0,
                            reduction='mean', loss_weight=1.0)
    out = jax.block_until_ready(out)
    ref = _reference(cls_score, label, label_smooth_eps=0.1, num_classes=C)
    assert jnp.allclose(out, ref, atol=1e-5, rtol=1e-5), (out, ref)

    # Case 2: non-multiple-of-8 batch, bf16 logits fed natively, 'sum',
    # temperature != 1 -> exercises padding/masking + native-dtype path.
    N2, C2 = 13, 32
    cls2 = jax.random.normal(k3, (N2, C2), dtype=jnp.float32).astype(jnp.bfloat16)
    lbl2 = jax.random.randint(k4, (N2,), 0, C2, dtype=jnp.int32)
    out2 = label_smooth_loss(cls2, lbl2, label_smooth_eps=0.2, num_classes=C2,
                             temperature=2.0, reduction='sum', loss_weight=0.5)
    out2 = jax.block_until_ready(out2)
    ref2 = _reference(cls2.astype(jnp.float32), lbl2, label_smooth_eps=0.2,
                      num_classes=C2, temperature=2.0, reduction='sum',
                      loss_weight=0.5)
    assert jnp.allclose(out2, ref2, atol=1e-3, rtol=1e-3), (out2, ref2)

    # Case 3: 'none' reduction (per-sample output, parallel grid).
    out3 = label_smooth_loss(cls_score, label, label_smooth_eps=0.1,
                             num_classes=C, reduction='none')
    out3 = jax.block_until_ready(out3)
    ref3 = _reference(cls_score, label, label_smooth_eps=0.1, num_classes=C,
                      reduction='none')
    assert jnp.allclose(out3, ref3, atol=1e-5, rtol=1e-5), (out3, ref3)

    print("KERNEL_OK")
</pallas_src>

<mosaic_0001>
module attributes {stable_mosaic.version = 11 : i64} {
  func.func @_sum_kernel(%arg0: i32, %arg1: memref<8x16xf32, #tpu.memory_space<vmem>>, %arg2: memref<8x1xi32, #tpu.memory_space<vmem>>, %arg3: memref<1x1xf32, #tpu.memory_space<vmem>>) attributes {dimension_semantics = [#tpu.dimension_semantics<arbitrary>], iteration_bounds = array<i64: 1>, scalar_prefetch = 0 : i64, scratch_operands = 0 : i64, tpu.core_type = #tpu.core_type<tc>, window_params = [{transform_indices = @transform_0, window_bounds = array<i64: 8, 16>}, {transform_indices = @transform_1, window_bounds = array<i64: 8, 1>}, {pipeline_mode = #tpu.pipeline_mode<synchronous>, transform_indices = @transform_2, window_bounds = array<i64: 1, 1>}]} {
    %c0 = arith.constant 0 : index
    %c0_0 = arith.constant 0 : index
    %0 = vector.load %arg1[%c0, %c0_0] : memref<8x16xf32, #tpu.memory_space<vmem>>, vector<8x16xf32>
    %cst = arith.constant dense<0xFF800000> : vector<8xf32>
    %1 = vector.multi_reduction <maximumf>, %0, %cst [1] : vector<8x16xf32> to vector<8xf32>
    %2 = vector.shape_cast %1 : vector<8xf32> to vector<8x1xf32>
    %3 = vector.broadcast %2 : vector<8x1xf32> to vector<8x16xf32>
    %4 = arith.subf %0, %3 : vector<8x16xf32>
    %5 = math.exp %4 : vector<8x16xf32>
    %cst_1 = arith.constant dense<0.000000e+00> : vector<8xf32>
    %6 = vector.multi_reduction <add>, %5, %cst_1 [1] : vector<8x16xf32> to vector<8xf32>
    %7 = vector.shape_cast %6 : vector<8xf32> to vector<8x1xf32>
    %8 = math.log %7 : vector<8x1xf32>
    %9 = arith.addf %2, %8 : vector<8x1xf32>
    %cst_2 = arith.constant dense<0.000000e+00> : vector<8xf32>
    %10 = vector.multi_reduction <add>, %0, %cst_2 [1] : vector<8x16xf32> to vector<8xf32>
    %11 = vector.shape_cast %10 : vector<8xf32> to vector<8x1xf32>
    %12 = tpu.iota {dimensions = array<i32: 1>} : vector<8x16xi32>
    %c0_3 = arith.constant 0 : index
    %c0_4 = arith.constant 0 : index
    %13 = vector.load %arg2[%c0_3, %c0_4] : memref<8x1xi32, #tpu.memory_space<vmem>>, vector<8x1xi32>
    %14 = vector.broadcast %13 : vector<8x1xi32> to vector<8x16xi32>
    %15 = arith.cmpi eq, %12, %14 : vector<8x16xi32>
    %cst_5 = arith.constant 0.000000e+00 : f32
    %16 = vector.broadcast %cst_5 : f32 to vector<8x16xf32>
    %17 = arith.select %15, %0, %16 : vector<8x16xi1>, vector<8x16xf32>
    %cst_6 = arith.constant dense<0.000000e+00> : vector<8xf32>
    %18 = vector.multi_reduction <add>, %17, %cst_6 [1] : vector<8x16xf32> to vector<8xf32>
    %19 = vector.shape_cast %18 : vector<8xf32> to vector<8x1xf32>
    %cst_7 = arith.constant 1.600000e+01 : f32
    %20 = vector.broadcast %cst_7 : f32 to vector<8x1xf32>
    %21 = arith.mulf %20, %9 : vector<8x1xf32>
    %22 = arith.subf %11, %21 : vector<8x1xf32>
    %cst_8 = arith.constant 6.250000e-03 : f32
    %23 = vector.broadcast %cst_8 : f32 to vector<8x1xf32>
    %24 = arith.mulf %23, %22 : vector<8x1xf32>
    %25 = arith.subf %19, %9 : vector<8x1xf32>
    %cst_9 = arith.constant 0.899999976 : f32
    %26 = vector.broadcast %cst_9 : f32 to vector<8x1xf32>
    %27 = arith.mulf %26, %25 : vector<8x1xf32>
    %28 = arith.addf %24, %27 : vector<8x1xf32>
    %cst_10 = arith.constant 0.000000e+00 : f32
    %29 = vector.broadcast %cst_10 : f32 to vector<8x1xf32>
    %30 = arith.subf %29, %28 : vector<8x1xf32>
    %c8_i32 = arith.constant 8 : i32
    %31 = arith.muli %arg0, %c8_i32 : i32
    %32 = tpu.iota {dimensions = array<i32: 0>} : vector<8x1xi32>
    %33 = vector.broadcast %31 : i32 to vector<8x1xi32>
    %34 = arith.addi %33, %32 : vector<8x1xi32>
    %c8_i32_11 = arith.constant 8 : i32
    %35 = vector.broadcast %c8_i32_11 : i32 to vector<8x1xi32>
    %36 = arith.cmpi slt, %34, %35 : vector<8x1xi32>
    %cst_12 = arith.constant 0.000000e+00 : f32
    %37 = vector.broadcast %cst_12 : f32 to vector<8x1xf32>
    %38 = arith.select %36, %30, %37 : vector<8x1xi1>, vector<8x1xf32>
    %c0_i32 = arith.constant 0 : i32
    %39 = arith.cmpi eq, %arg0, %c0_i32 : i32
    %40 = arith.extui %39 : i1 to i32
    %c0_i32_13 = arith.constant 0 : i32
    %41 = arith.cmpi ne, %40, %c0_i32_13 : i32
    scf.if %41 {
      %cst_19 = arith.constant 0.000000e+00 : f32
      %47 = vector.broadcast %cst_19 : f32 to vector<1x1xf32>
      %c0_20 = arith.constant 0 : index
      %c0_21 = arith.constant 0 : index
      %48 = vector.load %arg3[%c0_20, %c0_21] : memref<1x1xf32, #tpu.memory_space<vmem>>, vector<1x1xf32>
      tpu.vector_store %arg3[%c0_20, %c0_21], %47 {strides = array<i32>} : memref<1x1xf32, #tpu.memory_space<vmem>>, vector<1x1xf32>,
    } else {
    }
    %c0_14 = arith.constant 0 : index
    %c0_15 = arith.constant 0 : index
    %42 = vector.load %arg3[%c0_14, %c0_15] : memref<1x1xf32, #tpu.memory_space<vmem>>, vector<1x1xf32>
    %cst_16 = arith.constant dense<0.000000e+00> : vector<1xf32>
    %43 = vector.multi_reduction <add>, %38, %cst_16 [0] : vector<8x1xf32> to vector<1xf32>
    %44 = vector.shape_cast %43 : vector<1xf32> to vector<1x1xf32>
    %45 = arith.addf %42, %44 : vector<1x1xf32>
    %c0_17 = arith.constant 0 : index
    %c0_18 = arith.constant 0 : index
    %46 = vector.load %arg3[%c0_17, %c0_18] : memref<1x1xf32, #tpu.memory_space<vmem>>, vector<1x1xf32>
    tpu.vector_store %arg3[%c0_17, %c0_18], %45 {strides = array<i32>} : memref<1x1xf32, #tpu.memory_space<vmem>>, vector<1x1xf32>,
    return
  }
  func.func @transform_0(%arg0: i32) -> (i32, i32) {
    %c0_i32 = arith.constant 0 : i32
    %c0_i32_0 = arith.constant 0 : i32
    return %arg0, %c0_i32 : i32, i32
  }
  func.func @transform_1(%arg0: i32) -> (i32, i32) {
    %c0_i32 = arith.constant 0 : i32
    %c0_i32_0 = arith.constant 0 : i32
    return %arg0, %c0_i32 : i32, i32
  }
  func.func @transform_2(%arg0: i32) -> (i32, i32) {
    %c0_i32 = arith.constant 0 : i32
    %c0_i32_0 = arith.constant 0 : i32
    %c0_i32_1 = arith.constant 0 : i32
    return %c0_i32, %c0_i32_0 : i32, i32
  }
}

</mosaic_0001>

<bundles_post_ra>
// kernel: tpu_custom_call.1
= control target key start
LH: loop header
LB: loop body
LE: loop exit
PB: predicated region body
PF: predicated region fallthrough
CT: control target
= control target key end

     0   :  { %vm13_vm0 = vcmask 130048   ;;  %s158_s0 = inlined_call_operand.vmem [shape: f32[8,16], index: 0, kind: input, shape index: {}]   ;;  %s159_s1 = inlined_call_operand.vmem [shape: s32[8,1], index: 1, kind: input, shape index: {}]   ;;  %s160_s2 = inlined_call_operand.hbm [shape: f32[1,1], index: 2, kind: output, shape index: {}]  }
   0x1   :  { %v12_v0 = vld [vmem:[%s158_s0] sm:$0xff] }
   0x2   :  { %7 = vsyncpa [#allocation3], 0  ;;  %v14_v1 = vsel %vm13_vm0, %v12_v0, -inf  ;;  %v116_v2 = vmov 0   ;;  %v31_v3 = vld [vmem:[%s159_s1] sm:$0xff]  ;;  %v29_v7 = vlaneseq  ;;  %v26_v12 = vsel %vm13_vm0, %v12_v0, 0.0 }
   0x3   :  { %87 = vset.pattern.permute.xlu0 %v116_v2  ;;  %vm58_vm2 = vcmask 0   ;;  %v117_v15 = vmov 0.0   ;;  %s118_s0 = smov [#allocation2]  }
   0x4   :  { %15 = vmax.xlane.f32.xlu0 %v14_v1  ;;  %v30_v8 = vand.u32 127, %v29_v7  ;;  %59 = vst.msk [vmem:[#allocation2] sm:$0x1] %vm58_vm2, %v117_v15  ;;  %s76_s1 = sshll.u32 %s118_s0, 4  ;;  %s77_s1 = int_to_ptr.vmem [resolvable:$true] %s76_s1 }
   0x5   :  { %s92_s13 = scalar_lea.vmem %s77_s1, 16  ;;  %s96_s14 = scalar_lea.vmem %s77_s1, 32 }
   0x6   :  { %p93_p0 = scmp.ne.s32.totalorder %s77_s1, %s92_s13  ;;  %p97_p1 = scmp.lt.s32.totalorder %s77_s1, %s77_s1 }
   0x7   :  { %p98_p2 = scmp.lt.s32.totalorder %s96_s14, %s92_s13 }
   0x9   :  { %p99_p3 = por %p98_p2, %p97_p1 }
   0xb   :  { %v60_v34 = vld [vmem:[#allocation2] sm:$0x1]  ;;  %p100_p4 = pnand %p99_p3, %p93_p0 }
  0x1a   :  { %33 = vperm.xlu0 %87, %v31_v3  }
  0x91   :  { %v16_v4 = vpop.xlane.xlu0 %15 }
  0x92   :  { %v17_v5 = vsub.f32 %v12_v0, %v16_v4 }
  0x94   :  { %v18_v6 = vmul.f32 1.442695, %v17_v5 }
  0x96   :  { %88 = vpow2.f32 %v18_v6 }
  0x99   :  { %v34_v9 = vpop.permute.xlu0 %33 }
  0x9a   :  { %vm35_vm1 = vcmp.eq.s32.totalorder %v30_v8, %v34_v9 }
  0x9b   :  { %v36_v13 = vsel %vm35_vm1, %v12_v0, 0.0 }
  0x9c   :  { %v37_v14 = vsel %vm13_vm0, %v36_v13, 0.0 }
  0xa0   :  { %v89_v10 = vpop.eup %88 }
  0xa1   :  { %v20_v11 = vsel %vm13_vm0, %v89_v10, 0.0 }
  0xa2   :  { %21 = vadd.xlane.f32.xlu1 %v20_v11 }
  0xa6   :  { %27 = vadd.xlane.f32.xlu1 %v26_v12 }
  0xaa   :  { %38 = vadd.xlane.f32.xlu1 %v37_v14 }
 0x12f   :  { %v22_v16 = vpop.xlane.xlu1 %21 }
 0x130   :  { %90 = vlog2.f32 %v22_v16 }
 0x133   :  { %v28_v17 = vpop.xlane.xlu1 %27 }
 0x137   :  { %v39_v20 = vpop.xlane.xlu1 %38 }
 0x13a   :  { %v91_v18 = vpop.eup %90 }
 0x13b   :  { %v24_v19 = vmul.f32 0.6931472, %v91_v18 }
 0x13d   :  { %v25_v21 = vadd.f32 %v24_v19, %v16_v4 }
 0x13f   :  { %v40_v22 = vmul.f32 16.0, %v25_v21  ;;  %v43_v23 = vsub.f32 %v39_v20, %v25_v21 }
 0x141   :  { %v41_v24 = vsub.f32 %v28_v17, %v40_v22  ;;  %v44_v26 = vmul.f32 0.9, %v43_v23 }
 0x143   :  { %v42_v25 = vmul.f32 0.00625, %v41_v24 }
 0x145   :  { %v45_v27 = vadd.f32 %v44_v26, %v42_v25 }
 0x147   :  { %v46_v28 = vsub.f32 0.0, %v45_v27 }
 0x149   :  { %v61_v29 = vrot.slane %v46_v28, 4 }
 0x14b   :  { %v62_v30 = vadd.f32 %v61_v29, %v46_v28 }
 0x14d   :  { %v63_v31 = vrot.slane %v62_v30, 2 }
 0x14f   :  { %v64_v32 = vadd.f32 %v63_v31, %v62_v30 }
 0x151   :  { %v65_v33 = vrot.slane %v64_v32, 1 }
 0x153   :  { %v66_v35 = vadd.f32 %v65_v33, %v64_v32 }
 0x155   :  { %v67_v36 = vadd.f32 %v66_v35, %v60_v34 }
 0x157   :  { %69 = vst.msk [vmem:[#allocation2] sm:$0x1] %vm58_vm2, %v67_v36 }
 0x158   :  { %103 = shalt.err (!%p100_p4)
}
 0x159   :  { %s104_s17 = scalar_lea.hbm %s160_s2, 16 }
 0x15a   :  { %p105_p5 = scmp.ne.s32.totalorder %s160_s2, %s104_s17  ;;  %p108_p6 = scmp.lt.u32.totalorder %s104_s17, %s160_s2 }
 0x15c   :  { %p110_p7 = pnand %p108_p6, %p105_p5 }
 0x15e   :  { %113 = shalt.err (!%p110_p7)
}
 0x15f   :  { %79 = dma.vmem_to_hbm [thread:$0]  %s77_s1, 16, %s160_s2, [#allocation3]  }
 0x160   :  { %114 = dma.done.wait [#allocation3], 16  }
 0x161   :  { %115 = vsyncadd [#allocation3], 4294967280 }
 0x162   :  { %83 = vsyncpa [#allocation3], 1 }

</bundles_post_ra>
